<compile_context>
chip_gen: v5e
topology: v5e:2x2
jax: 0.10.0
libtpu: 0.0.40
codegen_flags: <defaults>
</compile_context>

<pallas_src>
import functools

import jax
import jax.numpy as jnp
from jax import lax
from jax.experimental import pallas as pl
from jax.experimental.pallas import tpu as pltpu

EPS = 1e-5


def _basic_block_kernel(x_ref, w1_ref, g1_ref, b1_ref, w2_ref, g2_ref, b2_ref,
                        out_ref, pad_ref, *, channels):
    # x_ref   : (N, H, W*C) f32   fused NHWC input (also the residual)
    # w*_ref  : (3, W*C, W*C) bf16 banded conv weights (one band per ky)
    # g*/b*   : (1, W*C) f32      gamma/beta pre-expanded to the fused lanes
    # out_ref : (N, H, W*C) f32
    # pad_ref : VMEM scratch (N, H+2, W*C) f32, H-padded staging (reused twice)
    n, hh, wc = x_ref.shape
    c = channels
    m = n * hh * (wc // c)          # elements per channel for the batch stats
    nh = n * hh

    # ---- stage x into the H-padded scratch (zero only the 2 border rows) ----
    pad_ref[:, 0:1, :] = jnp.zeros((n, 1, wc), pad_ref.dtype)
    pad_ref[:, hh + 1:hh + 2, :] = jnp.zeros((n, 1, wc), pad_ref.dtype)
    x_f = x_ref[...]                                   # (N, H, WC) f32
    pad_ref[:, 1:hh + 1, :] = x_f

    # one-hot "same channel" spreader: A[k, k'] = (k % C == k' % C)
    row = lax.broadcasted_iota(jnp.int32, (wc, wc), 0)
    col = lax.broadcasted_iota(jnp.int32, (wc, wc), 1)
    chan_eq = ((row % c) == (col % c)).astype(jnp.float32)   # (WC, WC)

    def conv3x3(w_ref):
        # 3 banded matmuls (one per ky); kx, Cin and the W-padding are fused
        # into a single K = W*C contraction, bf16 inputs, f32 accumulation.
        acc = jnp.zeros((nh, wc), jnp.float32)
        for ky in range(3):
            slab = pad_ref[:, ky:ky + hh, :].reshape(nh, wc).astype(jnp.bfloat16)
            acc += jnp.dot(slab, w_ref[ky], preferred_element_type=jnp.float32)
        return acc                                      # (N*H, W*C) f32

    def batchnorm(acc, g_ref, b_ref):
        # training-mode BN: per-channel batch mean / biased variance, two-pass.
        # dot(.., chan_eq) + row-sum gives every fused lane its channel's total.
        mean_f = jnp.sum(jnp.dot(acc, chan_eq, preferred_element_type=jnp.float32),
                         axis=0, keepdims=True) / m     # (1, WC)
        d = acc - mean_f
        var_f = jnp.sum(jnp.dot(d * d, chan_eq, preferred_element_type=jnp.float32),
                        axis=0, keepdims=True) / m      # (1, WC)
        scale = g_ref[...] * lax.rsqrt(var_f + EPS)     # (1, WC)
        return acc * scale + (b_ref[...] - mean_f * scale)

    # ---- conv1 -> bn1 -> relu ----
    h1 = jnp.maximum(batchnorm(conv3x3(w1_ref), g1_ref, b1_ref), 0.0)

    # ---- stage h1 into the (still zero-bordered) scratch for conv2 ----
    pad_ref[:, 1:hh + 1, :] = h1.reshape(n, hh, wc)

    # ---- conv2 -> bn2 -> +residual -> relu, lane-dense store ----
    out = batchnorm(conv3x3(w2_ref), g2_ref, b2_ref) + x_f.reshape(nh, wc)
    out_ref[...] = jnp.maximum(out, 0.0).reshape(n, hh, wc).astype(out_ref.dtype)


def _band_conv_weight(w, width):
    """(Cout, Cin, 3, 3) PyTorch conv weight -> (3, W*Cin, W*Cout) banded mats.

    band[ky, x*Cin + cin, x'*Cout + cout] = w[cout, cin, ky, x - x' + 1]
    (zero when x - x' + 1 is outside [0, 2]); this folds the kx taps and the
    width-direction zero padding into one K = W*Cin contraction per ky.
    """
    cin, cout = w.shape[1], w.shape[0]
    xs = jnp.arange(width)
    kx = xs[:, None] - xs[None, :] + 1                       # (W, W)
    valid = ((kx >= 0) & (kx <= 2)).astype(w.dtype)
    kx_c = jnp.clip(kx, 0, 2)
    w_t = jnp.transpose(w, (2, 3, 1, 0))                     # (ky, kx, cin, cout)
    blocks = w_t[:, kx_c] * valid[None, :, :, None, None]    # (3, W, W, cin, cout)
    blocks = jnp.transpose(blocks, (0, 1, 3, 2, 4))          # (3, W, cin, W, cout)
    return blocks.reshape(3, width * cin, width * cout)


def basic_block_forward(x_nchw, w1, gamma1, beta1, w2, gamma2, beta2):
    """BasicBlock forward (training-mode BN, stride=1, no downsample).

    x_nchw: (N, C, H, W) f32;  w1, w2: (C, C, 3, 3) PyTorch OIHW layout.
    """
    n, c, h, w = x_nchw.shape
    wc = w * c

    # NCHW -> NHWC -> fused lane-dense (N, H, W*C)
    x_f = jnp.transpose(x_nchw, (0, 2, 3, 1)).reshape(n, h, wc)

    wb1 = _band_conv_weight(w1, w).astype(jnp.bfloat16)
    wb2 = _band_conv_weight(w2, w).astype(jnp.bfloat16)
    # gamma/beta expanded to the fused lane layout (lane k -> channel k % C)
    g1 = jnp.tile(gamma1.astype(jnp.float32), w).reshape(1, wc)
    b1 = jnp.tile(beta1.astype(jnp.float32), w).reshape(1, wc)
    g2 = jnp.tile(gamma2.astype(jnp.float32), w).reshape(1, wc)
    b2 = jnp.tile(beta2.astype(jnp.float32), w).reshape(1, wc)

    vmem = pl.BlockSpec(memory_space=pltpu.MemorySpace.VMEM)
    out_f = pl.pallas_call(
        functools.partial(_basic_block_kernel, channels=c),
        out_shape=jax.ShapeDtypeStruct((n, h, wc), jnp.float32),
        in_specs=[vmem] * 7,
        out_specs=vmem,
        scratch_shapes=[pltpu.VMEM((n, h + 2, wc), jnp.float32)],
    )(x_f, wb1, g1, b1, wb2, g2, b2)

    # fused NHWC -> NCHW
    return jnp.transpose(out_f.reshape(n, h, w, c), (0, 3, 1, 2))


if __name__ == "__main__":
    key = jax.random.PRNGKey(0)
    k_x, k_w1, k_w2 = jax.random.split(key, 3)

    # input_channel == output_channel (downsample=None); W*C = 128 = one lane tile
    N, C, H, W = 2, 8, 16, 16
    x = jax.random.normal(k_x, (N, C, H, W), jnp.float32)

    fan_in = C * 3 * 3
    w1 = jax.random.normal(k_w1, (C, C, 3, 3), jnp.float32) * (2.0 / fan_in) ** 0.5
    w2 = jax.random.normal(k_w2, (C, C, 3, 3), jnp.float32) * (2.0 / fan_in) ** 0.5
    gamma1 = jnp.ones((C,), jnp.float32)
    beta1 = jnp.zeros((C,), jnp.float32)
    gamma2 = jnp.ones((C,), jnp.float32)
    beta2 = jnp.zeros((C,), jnp.float32)

    out = basic_block_forward(x, w1, gamma1, beta1, w2, gamma2, beta2)
    jax.block_until_ready(out)
    assert out.shape == (N, C, H, W)

    # Pure-JAX f32 reference; the kernel feeds the MXU bf16 inputs, so compare
    # with a loose tolerance.
    def _ref(xv, wa, ga, ba, wb, gb, bb):
        def conv(v, wgt):
            return lax.conv_general_dilated(
                v, wgt, (1, 1), ((1, 1), (1, 1)),
                dimension_numbers=("NCHW", "OIHW", "NCHW"))

        def bn(v, g, b):
            mu = jnp.mean(v, axis=(0, 2, 3), keepdims=True)
            var = jnp.mean((v - mu) ** 2, axis=(0, 2, 3), keepdims=True)
            return (v - mu) * lax.rsqrt(var + EPS) * g.reshape(1, -1, 1, 1) \
                + b.reshape(1, -1, 1, 1)

        h1 = jax.nn.relu(bn(conv(xv, wa), ga, ba))
        return jax.nn.relu(bn(conv(h1, wb), gb, bb) + xv)

    ref = _ref(x, w1, gamma1, beta1, w2, gamma2, beta2)
    assert jnp.allclose(out, ref, atol=5e-2, rtol=5e-2), \
        float(jnp.max(jnp.abs(out - ref)))
    print("KERNEL_OK")
</pallas_src>

<mosaic_0001>
module attributes {stable_mosaic.version = 11 : i64} {
  func.func @_basic_block_kernel(%arg0: memref<2x16x128xf32, #tpu.memory_space<vmem>>, %arg1: memref<3x128x128xbf16, #tpu.memory_space<vmem>>, %arg2: memref<1x128xf32, #tpu.memory_space<vmem>>, %arg3: memref<1x128xf32, #tpu.memory_space<vmem>>, %arg4: memref<3x128x128xbf16, #tpu.memory_space<vmem>>, %arg5: memref<1x128xf32, #tpu.memory_space<vmem>>, %arg6: memref<1x128xf32, #tpu.memory_space<vmem>>, %arg7: memref<2x16x128xf32, #tpu.memory_space<vmem>>, %arg8: memref<2x18x128xf32, #tpu.memory_space<vmem>>) attributes {dimension_semantics = [], scalar_prefetch = 0 : i64, scratch_operands = 1 : i64, tpu.core_type = #tpu.core_type<tc>} {
    %cst = arith.constant 0.000000e+00 : f32
    %0 = vector.broadcast %cst : f32 to vector<2x1x128xf32>
    %c0 = arith.constant 0 : index
    %c0_0 = arith.constant 0 : index
    %c0_1 = arith.constant 0 : index
    %1 = vector.load %arg8[%c0, %c0_0, %c0_1] : memref<2x18x128xf32, #tpu.memory_space<vmem>>, vector<2x1x128xf32>
    tpu.vector_store %arg8[%c0, %c0_0, %c0_1], %0 {strides = array<i32>} : memref<2x18x128xf32, #tpu.memory_space<vmem>>, vector<2x1x128xf32>,
    %cst_2 = arith.constant 0.000000e+00 : f32
    %2 = vector.broadcast %cst_2 : f32 to vector<2x1x128xf32>
    %c0_3 = arith.constant 0 : index
    %c17 = arith.constant 17 : index
    %c0_4 = arith.constant 0 : index
    %3 = vector.load %arg8[%c0_3, %c17, %c0_4] : memref<2x18x128xf32, #tpu.memory_space<vmem>>, vector<2x1x128xf32>
    tpu.vector_store %arg8[%c0_3, %c17, %c0_4], %2 {strides = array<i32>} : memref<2x18x128xf32, #tpu.memory_space<vmem>>, vector<2x1x128xf32>,
    %c0_5 = arith.constant 0 : index
    %c0_6 = arith.constant 0 : index
    %c0_7 = arith.constant 0 : index
    %4 = vector.load %arg0[%c0_5, %c0_6, %c0_7] : memref<2x16x128xf32, #tpu.memory_space<vmem>>, vector<2x16x128xf32>
    %c0_8 = arith.constant 0 : index
    %c1 = arith.constant 1 : index
    %c0_9 = arith.constant 0 : index
    %5 = vector.load %arg8[%c0_8, %c1, %c0_9] : memref<2x18x128xf32, #tpu.memory_space<vmem>>, vector<2x16x128xf32>
    tpu.vector_store %arg8[%c0_8, %c1, %c0_9], %4 {strides = array<i32>} : memref<2x18x128xf32, #tpu.memory_space<vmem>>, vector<2x16x128xf32>,
    %6 = tpu.iota {dimensions = array<i32: 0>} : vector<128x128xi32>
    %7 = tpu.iota {dimensions = array<i32: 1>} : vector<128x128xi32>
    %c8_i32 = arith.constant 8 : i32
    %c0_i32 = arith.constant 0 : i32
    %8 = arith.cmpi eq, %c8_i32, %c0_i32 : i32
    %c1_i32 = arith.constant 1 : i32
    %9 = arith.select %8, %c1_i32, %c8_i32 : i32
    %10 = vector.broadcast %9 : i32 to vector<128x128xi32>
    %11 = arith.remsi %6, %10 : vector<128x128xi32>
    %c0_i32_10 = arith.constant 0 : i32
    %12 = vector.broadcast %c0_i32_10 : i32 to vector<128x128xi32>
    %13 = arith.cmpi ne, %11, %12 : vector<128x128xi32>
    %c0_i32_11 = arith.constant 0 : i32
    %14 = vector.broadcast %c0_i32_11 : i32 to vector<128x128xi32>
    %15 = arith.cmpi slt, %11, %14 : vector<128x128xi32>
    %c0_i32_12 = arith.constant 0 : i32
    %16 = arith.cmpi slt, %9, %c0_i32_12 : i32
    %17 = vector.broadcast %16 : i1 to vector<128x128xi1>
    %18 = vector.broadcast %17 : vector<128x128xi1> to vector<128x128xi1>
    %19 = arith.xori %15, %18 : vector<128x128xi1>
    %20 = arith.andi %19, %13 : vector<128x128xi1>
    %21 = vector.broadcast %9 : i32 to vector<128x128xi32>
    %22 = arith.addi %11, %21 : vector<128x128xi32>
    %23 = arith.select %20, %22, %11 : vector<128x128xi1>, vector<128x128xi32>
    %c8_i32_13 = arith.constant 8 : i32
    %c0_i32_14 = arith.constant 0 : i32
    %24 = arith.cmpi eq, %c8_i32_13, %c0_i32_14 : i32
    %c1_i32_15 = arith.constant 1 : i32
    %25 = arith.select %24, %c1_i32_15, %c8_i32_13 : i32
    %26 = vector.broadcast %25 : i32 to vector<128x128xi32>
    %27 = arith.remsi %7, %26 : vector<128x128xi32>
    %c0_i32_16 = arith.constant 0 : i32
    %28 = vector.broadcast %c0_i32_16 : i32 to vector<128x128xi32>
    %29 = arith.cmpi ne, %27, %28 : vector<128x128xi32>
    %c0_i32_17 = arith.constant 0 : i32
    %30 = vector.broadcast %c0_i32_17 : i32 to vector<128x128xi32>
    %31 = arith.cmpi slt, %27, %30 : vector<128x128xi32>
    %c0_i32_18 = arith.constant 0 : i32
    %32 = arith.cmpi slt, %25, %c0_i32_18 : i32
    %33 = vector.broadcast %32 : i1 to vector<128x128xi1>
    %34 = vector.broadcast %33 : vector<128x128xi1> to vector<128x128xi1>
    %35 = arith.xori %31, %34 : vector<128x128xi1>
    %36 = arith.andi %35, %29 : vector<128x128xi1>
    %37 = vector.broadcast %25 : i32 to vector<128x128xi32>
    %38 = arith.addi %27, %37 : vector<128x128xi32>
    %39 = arith.select %36, %38, %27 : vector<128x128xi1>, vector<128x128xi32>
    %40 = arith.cmpi eq, %23, %39 : vector<128x128xi32>
    %41 = arith.extui %40 : vector<128x128xi1> to vector<128x128xi32>
    %42 = arith.sitofp %41 : vector<128x128xi32> to vector<128x128xf32>
    %cst_19 = arith.constant 0.000000e+00 : f32
    %43 = vector.broadcast %cst_19 : f32 to vector<32x128xf32>
    %c0_20 = arith.constant 0 : index
    %c0_21 = arith.constant 0 : index
    %c0_22 = arith.constant 0 : index
    %44 = vector.load %arg8[%c0_20, %c0_21, %c0_22] : memref<2x18x128xf32, #tpu.memory_space<vmem>>, vector<2x16x128xf32>
    %45 = vector.shape_cast %44 : vector<2x16x128xf32> to vector<32x128xf32>
    %46 = arith.truncf %45 : vector<32x128xf32> to vector<32x128xbf16>
    %c0_23 = arith.constant 0 : index
    %c0_24 = arith.constant 0 : index
    %c0_25 = arith.constant 0 : index
    %47 = vector.load %arg1[%c0_23, %c0_24, %c0_25] : memref<3x128x128xbf16, #tpu.memory_space<vmem>>, vector<1x128x128xbf16>
    %48 = vector.shape_cast %47 : vector<1x128x128xbf16> to vector<128x128xbf16>
    %cst_26 = arith.constant dense<0.000000e+00> : vector<32x128xf32>
    %49 = tpu.matmul %46, %48, %cst_26 {dimension_numbers = #tpu.dot_dimension_numbers<[1], [0], [0], [1], [0, 0, 1, 1], [], []>} : vector<32x128xbf16>, vector<128x128xbf16>, vector<32x128xf32> -> vector<32x128xf32>
    %50 = arith.addf %43, %49 : vector<32x128xf32>
    %c0_27 = arith.constant 0 : index
    %c1_28 = arith.constant 1 : index
    %c0_29 = arith.constant 0 : index
    %51 = vector.load %arg8[%c0_27, %c1_28, %c0_29] : memref<2x18x128xf32, #tpu.memory_space<vmem>>, vector<2x16x128xf32>
    %52 = vector.shape_cast %51 : vector<2x16x128xf32> to vector<32x128xf32>
    %53 = arith.truncf %52 : vector<32x128xf32> to vector<32x128xbf16>
    %c1_30 = arith.constant 1 : index
    %c0_31 = arith.constant 0 : index
    %c0_32 = arith.constant 0 : index
    %54 = vector.load %arg1[%c1_30, %c0_31, %c0_32] : memref<3x128x128xbf16, #tpu.memory_space<vmem>>, vector<1x128x128xbf16>
    %55 = vector.shape_cast %54 : vector<1x128x128xbf16> to vector<128x128xbf16>
    %cst_33 = arith.constant dense<0.000000e+00> : vector<32x128xf32>
    %56 = tpu.matmul %53, %55, %cst_33 {dimension_numbers = #tpu.dot_dimension_numbers<[1], [0], [0], [1], [0, 0, 1, 1], [], []>} : vector<32x128xbf16>, vector<128x128xbf16>, vector<32x128xf32> -> vector<32x128xf32>
    %57 = arith.addf %50, %56 : vector<32x128xf32>
    %c0_34 = arith.constant 0 : index
    %c2 = arith.constant 2 : index
    %c0_35 = arith.constant 0 : index
    %58 = vector.load %arg8[%c0_34, %c2, %c0_35] : memref<2x18x128xf32, #tpu.memory_space<vmem>>, vector<2x16x128xf32>
    %59 = vector.shape_cast %58 : vector<2x16x128xf32> to vector<32x128xf32>
    %60 = arith.truncf %59 : vector<32x128xf32> to vector<32x128xbf16>
    %c2_36 = arith.constant 2 : index
    %c0_37 = arith.constant 0 : index
    %c0_38 = arith.constant 0 : index
    %61 = vector.load %arg1[%c2_36, %c0_37, %c0_38] : memref<3x128x128xbf16, #tpu.memory_space<vmem>>, vector<1x128x128xbf16>
    %62 = vector.shape_cast %61 : vector<1x128x128xbf16> to vector<128x128xbf16>
    %cst_39 = arith.constant dense<0.000000e+00> : vector<32x128xf32>
    %63 = tpu.matmul %60, %62, %cst_39 {dimension_numbers = #tpu.dot_dimension_numbers<[1], [0], [0], [1], [0, 0, 1, 1], [], []>} : vector<32x128xbf16>, vector<128x128xbf16>, vector<32x128xf32> -> vector<32x128xf32>
    %64 = arith.addf %57, %63 : vector<32x128xf32>
    %cst_40 = arith.constant dense<0.000000e+00> : vector<32x128xf32>
    %65 = tpu.matmul %64, %42, %cst_40 {dimension_numbers = #tpu.dot_dimension_numbers<[1], [0], [0], [1], [0, 0, 1, 1], [], []>} : vector<32x128xf32>, vector<128x128xf32>, vector<32x128xf32> -> vector<32x128xf32>
    %cst_41 = arith.constant dense<0.000000e+00> : vector<128xf32>
    %66 = vector.multi_reduction <add>, %65, %cst_41 [0] : vector<32x128xf32> to vector<128xf32>
    %67 = vector.shape_cast %66 : vector<128xf32> to vector<1x128xf32>
    %cst_42 = arith.constant 5.120000e+02 : f32
    %68 = vector.broadcast %cst_42 : f32 to vector<1x128xf32>
    %69 = arith.divf %67, %68 : vector<1x128xf32>
    %70 = vector.broadcast %69 : vector<1x128xf32> to vector<32x128xf32>
    %71 = arith.subf %64, %70 : vector<32x128xf32>
    %72 = arith.mulf %71, %71 : vector<32x128xf32>
    %cst_43 = arith.constant dense<0.000000e+00> : vector<32x128xf32>
    %73 = tpu.matmul %72, %42, %cst_43 {dimension_numbers = #tpu.dot_dimension_numbers<[1], [0], [0], [1], [0, 0, 1, 1], [], []>} : vector<32x128xf32>, vector<128x128xf32>, vector<32x128xf32> -> vector<32x128xf32>
    %cst_44 = arith.constant dense<0.000000e+00> : vector<128xf32>
    %74 = vector.multi_reduction <add>, %73, %cst_44 [0] : vector<32x128xf32> to vector<128xf32>
    %75 = vector.shape_cast %74 : vector<128xf32> to vector<1x128xf32>
    %cst_45 = arith.constant 5.120000e+02 : f32
    %76 = vector.broadcast %cst_45 : f32 to vector<1x128xf32>
    %77 = arith.divf %75, %76 : vector<1x128xf32>
    %c0_46 = arith.constant 0 : index
    %c0_47 = arith.constant 0 : index
    %78 = vector.load %arg2[%c0_46, %c0_47] : memref<1x128xf32, #tpu.memory_space<vmem>>, vector<1x128xf32>
    %cst_48 = arith.constant 9.99999974E-6 : f32
    %79 = vector.broadcast %cst_48 : f32 to vector<1x128xf32>
    %80 = arith.addf %77, %79 : vector<1x128xf32>
    %81 = math.rsqrt %80 : vector<1x128xf32>
    %82 = arith.mulf %78, %81 : vector<1x128xf32>
    %83 = vector.broadcast %82 : vector<1x128xf32> to vector<32x128xf32>
    %84 = arith.mulf %64, %83 : vector<32x128xf32>
    %c0_49 = arith.constant 0 : index
    %c0_50 = arith.constant 0 : index
    %85 = vector.load %arg3[%c0_49, %c0_50] : memref<1x128xf32, #tpu.memory_space<vmem>>, vector<1x128xf32>
    %86 = arith.mulf %69, %82 : vector<1x128xf32>
    %87 = arith.subf %85, %86 : vector<1x128xf32>
    %88 = vector.broadcast %87 : vector<1x128xf32> to vector<32x128xf32>
    %89 = arith.addf %84, %88 : vector<32x128xf32>
    %cst_51 = arith.constant 0.000000e+00 : f32
    %90 = vector.broadcast %cst_51 : f32 to vector<32x128xf32>
    %91 = arith.maximumf %89, %90 : vector<32x128xf32>
    %92 = vector.shape_cast %91 : vector<32x128xf32> to vector<2x16x128xf32>
    %c0_52 = arith.constant 0 : index
    %c1_53 = arith.constant 1 : index
    %c0_54 = arith.constant 0 : index
    %93 = vector.load %arg8[%c0_52, %c1_53, %c0_54] : memref<2x18x128xf32, #tpu.memory_space<vmem>>, vector<2x16x128xf32>
    tpu.vector_store %arg8[%c0_52, %c1_53, %c0_54], %92 {strides = array<i32>} : memref<2x18x128xf32, #tpu.memory_space<vmem>>, vector<2x16x128xf32>,
    %cst_55 = arith.constant 0.000000e+00 : f32
    %94 = vector.broadcast %cst_55 : f32 to vector<32x128xf32>
    %c0_56 = arith.constant 0 : index
    %c0_57 = arith.constant 0 : index
    %c0_58 = arith.constant 0 : index
    %95 = vector.load %arg8[%c0_56, %c0_57, %c0_58] : memref<2x18x128xf32, #tpu.memory_space<vmem>>, vector<2x16x128xf32>
    %96 = vector.shape_cast %95 : vector<2x16x128xf32> to vector<32x128xf32>
    %97 = arith.truncf %96 : vector<32x128xf32> to vector<32x128xbf16>
    %c0_59 = arith.constant 0 : index
    %c0_60 = arith.constant 0 : index
    %c0_61 = arith.constant 0 : index
    %98 = vector.load %arg4[%c0_59, %c0_60, %c0_61] : memref<3x128x128xbf16, #tpu.memory_space<vmem>>, vector<1x128x128xbf16>
    %99 = vector.shape_cast %98 : vector<1x128x128xbf16> to vector<128x128xbf16>
    %cst_62 = arith.constant dense<0.000000e+00> : vector<32x128xf32>
    %100 = tpu.matmul %97, %99, %cst_62 {dimension_numbers = #tpu.dot_dimension_numbers<[1], [0], [0], [1], [0, 0, 1, 1], [], []>} : vector<32x128xbf16>, vector<128x128xbf16>, vector<32x128xf32> -> vector<32x128xf32>
    %101 = arith.addf %94, %100 : vector<32x128xf32>
    %c0_63 = arith.constant 0 : index
    %c1_64 = arith.constant 1 : index
    %c0_65 = arith.constant 0 : index
    %102 = vector.load %arg8[%c0_63, %c1_64, %c0_65] : memref<2x18x128xf32, #tpu.memory_space<vmem>>, vector<2x16x128xf32>
    %103 = vector.shape_cast %102 : vector<2x16x128xf32> to vector<32x128xf32>
    %104 = arith.truncf %103 : vector<32x128xf32> to vector<32x128xbf16>
    %c1_66 = arith.constant 1 : index
    %c0_67 = arith.constant 0 : index
    %c0_68 = arith.constant 0 : index
    %105 = vector.load %arg4[%c1_66, %c0_67, %c0_68] : memref<3x128x128xbf16, #tpu.memory_space<vmem>>, vector<1x128x128xbf16>
    %106 = vector.shape_cast %105 : vector<1x128x128xbf16> to vector<128x128xbf16>
    %cst_69 = arith.constant dense<0.000000e+00> : vector<32x128xf32>
    %107 = tpu.matmul %104, %106, %cst_69 {dimension_numbers = #tpu.dot_dimension_numbers<[1], [0], [0], [1], [0, 0, 1, 1], [], []>} : vector<32x128xbf16>, vector<128x128xbf16>, vector<32x128xf32> -> vector<32x128xf32>
    %108 = arith.addf %101, %107 : vector<32x128xf32>
    %c0_70 = arith.constant 0 : index
    %c2_71 = arith.constant 2 : index
    %c0_72 = arith.constant 0 : index
    %109 = vector.load %arg8[%c0_70, %c2_71, %c0_72] : memref<2x18x128xf32, #tpu.memory_space<vmem>>, vector<2x16x128xf32>
    %110 = vector.shape_cast %109 : vector<2x16x128xf32> to vector<32x128xf32>
    %111 = arith.truncf %110 : vector<32x128xf32> to vector<32x128xbf16>
    %c2_73 = arith.constant 2 : index
    %c0_74 = arith.constant 0 : index
    %c0_75 = arith.constant 0 : index
    %112 = vector.load %arg4[%c2_73, %c0_74, %c0_75] : memref<3x128x128xbf16, #tpu.memory_space<vmem>>, vector<1x128x128xbf16>
    %113 = vector.shape_cast %112 : vector<1x128x128xbf16> to vector<128x128xbf16>
    %cst_76 = arith.constant dense<0.000000e+00> : vector<32x128xf32>
    %114 = tpu.matmul %111, %113, %cst_76 {dimension_numbers = #tpu.dot_dimension_numbers<[1], [0], [0], [1], [0, 0, 1, 1], [], []>} : vector<32x128xbf16>, vector<128x128xbf16>, vector<32x128xf32> -> vector<32x128xf32>
    %115 = arith.addf %108, %114 : vector<32x128xf32>
    %cst_77 = arith.constant dense<0.000000e+00> : vector<32x128xf32>
    %116 = tpu.matmul %115, %42, %cst_77 {dimension_numbers = #tpu.dot_dimension_numbers<[1], [0], [0], [1], [0, 0, 1, 1], [], []>} : vector<32x128xf32>, vector<128x128xf32>, vector<32x128xf32> -> vector<32x128xf32>
    %cst_78 = arith.constant dense<0.000000e+00> : vector<128xf32>
    %117 = vector.multi_reduction <add>, %116, %cst_78 [0] : vector<32x128xf32> to vector<128xf32>
    %118 = vector.shape_cast %117 : vector<128xf32> to vector<1x128xf32>
    %cst_79 = arith.constant 5.120000e+02 : f32
    %119 = vector.broadcast %cst_79 : f32 to vector<1x128xf32>
    %120 = arith.divf %118, %119 : vector<1x128xf32>
    %121 = vector.broadcast %120 : vector<1x128xf32> to vector<32x128xf32>
    %122 = arith.subf %115, %121 : vector<32x128xf32>
    %123 = arith.mulf %122, %122 : vector<32x128xf32>
    %cst_80 = arith.constant dense<0.000000e+00> : vector<32x128xf32>
    %124 = tpu.matmul %123, %42, %cst_80 {dimension_numbers = #tpu.dot_dimension_numbers<[1], [0], [0], [1], [0, 0, 1, 1], [], []>} : vector<32x128xf32>, vector<128x128xf32>, vector<32x128xf32> -> vector<32x128xf32>
    %cst_81 = arith.constant dense<0.000000e+00> : vector<128xf32>
    %125 = vector.multi_reduction <add>, %124, %cst_81 [0] : vector<32x128xf32> to vector<128xf32>
    %126 = vector.shape_cast %125 : vector<128xf32> to vector<1x128xf32>
    %cst_82 = arith.constant 5.120000e+02 : f32
    %127 = vector.broadcast %cst_82 : f32 to vector<1x128xf32>
    %128 = arith.divf %126, %127 : vector<1x128xf32>
    %c0_83 = arith.constant 0 : index
    %c0_84 = arith.constant 0 : index
    %129 = vector.load %arg5[%c0_83, %c0_84] : memref<1x128xf32, #tpu.memory_space<vmem>>, vector<1x128xf32>
    %cst_85 = arith.constant 9.99999974E-6 : f32
    %130 = vector.broadcast %cst_85 : f32 to vector<1x128xf32>
    %131 = arith.addf %128, %130 : vector<1x128xf32>
    %132 = math.rsqrt %131 : vector<1x128xf32>
    %133 = arith.mulf %129, %132 : vector<1x128xf32>
    %134 = vector.broadcast %133 : vector<1x128xf32> to vector<32x128xf32>
    %135 = arith.mulf %115, %134 : vector<32x128xf32>
    %c0_86 = arith.constant 0 : index
    %c0_87 = arith.constant 0 : index
    %136 = vector.load %arg6[%c0_86, %c0_87] : memref<1x128xf32, #tpu.memory_space<vmem>>, vector<1x128xf32>
    %137 = arith.mulf %120, %133 : vector<1x128xf32>
    %138 = arith.subf %136, %137 : vector<1x128xf32>
    %139 = vector.broadcast %138 : vector<1x128xf32> to vector<32x128xf32>
    %140 = arith.addf %135, %139 : vector<32x128xf32>
    %141 = vector.shape_cast %4 : vector<2x16x128xf32> to vector<32x128xf32>
    %142 = arith.addf %140, %141 : vector<32x128xf32>
    %cst_88 = arith.constant 0.000000e+00 : f32
    %143 = vector.broadcast %cst_88 : f32 to vector<32x128xf32>
    %144 = arith.maximumf %142, %143 : vector<32x128xf32>
    %145 = vector.shape_cast %144 : vector<32x128xf32> to vector<2x16x128xf32>
    %c0_89 = arith.constant 0 : index
    %c0_90 = arith.constant 0 : index
    %c0_91 = arith.constant 0 : index
    %146 = vector.load %arg7[%c0_89, %c0_90, %c0_91] : memref<2x16x128xf32, #tpu.memory_space<vmem>>, vector<2x16x128xf32>
    tpu.vector_store %arg7[%c0_89, %c0_90, %c0_91], %145 {strides = array<i32>} : memref<2x16x128xf32, #tpu.memory_space<vmem>>, vector<2x16x128xf32>,
    return
  }
}

</mosaic_0001>

<bundles_post_ra>
// kernel: tpu_custom_call.1
= control target key start
LH: loop header
LB: loop body
LE: loop exit
PB: predicated region body
PF: predicated region fallthrough
CT: control target
= control target key end

     0   :  { %12 = vsyncpa [#allocation4], 0  ;;  %s2195_s0 = inlined_call_operand.hbm [shape: f32[2,16,128], index: 0, kind: input, shape index: {}]   ;;  %s2196_s1 = inlined_call_operand.hbm [shape: bf16[3,128,128], index: 1, kind: input, shape index: {}]   ;;  %s2197_s2 = inlined_call_operand.vmem [shape: f32[1,128], index: 2, kind: input, shape index: {}]   ;;  %s2198_s3 = inlined_call_operand.vmem [shape: f32[1,128], index: 3, kind: input, shape index: {}]   ;;  %s2199_s4 = inlined_call_operand.hbm [shape: bf16[3,128,128], index: 4, kind: input, shape index: {}]   ;;  %s2200_s5 = inlined_call_operand.vmem [shape: f32[1,128], index: 5, kind: input, shape index: {}]   ;;  %s2201_s6 = inlined_call_operand.vmem [shape: f32[1,128], index: 6, kind: input, shape index: {}]   ;;  %s2202_s7 = inlined_call_operand.hbm [shape: f32[2,16,128], index: 7, kind: output, shape index: {}]  }
   0x1   :  { %13 = vsyncpa [#allocation7], 0  ;;  %s32_s26 = sshll.u32 %s2196_s1, 4  ;;  %s33_s26 = int_to_ptr.hbm [resolvable:$true] %s32_s26 }
   0x2   :  { %14 = vsyncpa [#allocation5], 0  ;;  %s1653_s27 = smov [#allocation6]   ;;  %s19_s8 = sshll.u32 %s2195_s0, 4  ;;  %s20_s8 = int_to_ptr.hbm [resolvable:$true] %s19_s8 }
   0x3   :  { %s34_s28 = sshll.u32 %s1653_s27, 4  ;;  %s1654_s9 = smov 64   ;;  %s35_s28 = int_to_ptr.vmem [resolvable:$true] %s34_s28 }
   0x4   :  { %s1655_s10 = smov 4   ;;  %s1656_s11 = smov [#allocation3]  }
   0x5   :  { %40 = dma.hbm_to_vmem [thread:$0]  %s33_s26, 3072, %s35_s28, [#allocation7], %s1654_s9, %s1654_s9, %s1655_s10  }
   0x6   :  { %s21_s12 = sshll.u32 %s1656_s11, 4  ;;  %s1657_s13 = smov 128   ;;  %s22_s12 = int_to_ptr.vmem [resolvable:$true] %s21_s12 }
   0x7   :  { %s1658_s14 = smov 8   ;;  %s49_s16 = sshll.u32 %s2199_s4, 4  ;;  %s50_s16 = int_to_ptr.hbm [resolvable:$true] %s49_s16 }
   0x8   :  { %27 = dma.hbm_to_vmem [thread:$0]  %s20_s8, 512, %s22_s12, [#allocation4], %s1657_s13, %s1657_s13, %s1658_s14  }
   0x9   :  { %s1659_s17 = smov [#allocation8]  }
   0xa   :  { %s51_s0 = sshll.u32 %s1659_s17, 4  ;;  %s52_s0 = int_to_ptr.vmem [resolvable:$true] %s51_s0 }
   0xb   :  { %57 = dma.hbm_to_vmem [thread:$0]  %s50_s16, 3072, %s52_s0, [#allocation7], %s1654_s9, %s1654_s9, %s1655_s10  }
   0xc   :  { %1647 = dma.done.wait [#allocation4], 512  }
   0xd   :  { %1648 = vsyncadd [#allocation4], 4294966784 }
   0xe   :  { %1649 = dma.done.wait [#allocation7], 6144  }
   0xf   :  { %1650 = vsyncadd [#allocation7], 4294961152  ;;  %v1660_v0 = vmov 0.0   ;;  %v1469_v1 = vld [vmem:[#allocation6 + $0x78] sm:$0xff]  ;;  %v1468_v4 = vld [vmem:[#allocation6 + $0x70] sm:$0xff]  ;;  %v86_v22 = vlaneseq  ;;  %v1661_v47 = vmov 1.0  }
  0x10   :  { %74 = vst [vmem:[#allocation2] sm:$0x1] %v1660_v0  ;;  %v1461_v2 = vld [vmem:[#allocation6 + $0x38] sm:$0xff]  ;;  %450 = vmatpush.bf16.msra.mxu0 %v1469_v1  ;;  %v1460_v5 = vld [vmem:[#allocation6 + $0x30] sm:$0xff]  ;;  %v1467_v7 = vld [vmem:[#allocation6 + $0x68] sm:$0xff]  ;;  %s1168_s25 = sshll.u32 %s2202_s7, 4  ;;  %s1169_s25 = int_to_ptr.hbm [resolvable:$true] %s1168_s25 }
  0x11   :  { %75 = vst [vmem:[#allocation2 + $0x18] sm:$0x1] %v1660_v0  ;;  %v1477_v3 = vld [vmem:[#allocation6 + $0xb8] sm:$0xff]  ;;  %517 = vmatpush.bf16.msra.mxu1 %v1461_v2  ;;  %v1476_v6 = vld [vmem:[#allocation6 + $0xb0] sm:$0xff]  ;;  %v1459_v8 = vld [vmem:[#allocation6 + $0x28] sm:$0xff]  ;;  %v1728_v24 = vshrl.u32 %v86_v22, 7 }
  0x12   :  { %76 = vst [vmem:[#allocation2 + $0x11] sm:$0x1] %v1660_v0  ;;  %607 = vmatpush.bf16.msra.mxu2 %v1477_v3  ;;  %v1475_v9 = vld [vmem:[#allocation6 + $0xa8] sm:$0xff]  ;;  %v1716_v10 = vld [vmem:[#allocation3] sm:$0xff]  ;;  %v1720_v12 = vld [vmem:[#allocation3 + $0x10] sm:$0xff]  ;;  %v104_v25 = vand.u32 127, %v86_v22 }
  0x13   :  { %77 = vst [vmem:[#allocation2 + $0x29] sm:$0x1] %v1660_v0  ;;  %v1718_v11 = vld [vmem:[#allocation3 + $0x8] sm:$0xff]  ;;  %v1723_v13 = vld [vmem:[#allocation3 + $0x18] sm:$0xff]  ;;  %v1466_v14 = vld [vmem:[#allocation6 + $0x60] sm:$0xff]  ;;  %v102_v28 = vadd.s32 120, %v1728_v24 }
  0x14   :  { %451 = vmatpush.bf16.msra.mxu0 %v1468_v4  ;;  %82 = vst [vmem:[#allocation2 + $0x1] sm:$0xff] %v1716_v10  ;;  %v1458_v15 = vld [vmem:[#allocation6 + $0x20] sm:$0xff]  ;;  %v1465_v17 = vld [vmem:[#allocation6 + $0x58] sm:$0xff]  ;;  %v1464_v20 = vld [vmem:[#allocation6 + $0x50] sm:$0xff]  ;;  %v1731_v29 = vand.u32 7, %v104_v25  ;;  %v101_v30 = vadd.s32 112, %v1728_v24  ;;  %v383_v51 = vpack.c.bf16 %v1718_v11, %v1716_v10 }
  0x15   :  { %518 = vmatpush.bf16.msra.mxu1 %v1460_v5  ;;  %83 = vst [vmem:[#allocation2 + $0x9] sm:$0xff] %v1718_v11  ;;  %v1474_v16 = vld [vmem:[#allocation6 + $0xa0] sm:$0xff]  ;;  %v1457_v18 = vld [vmem:[#allocation6 + $0x18] sm:$0xff]  ;;  %v1456_v21 = vld [vmem:[#allocation6 + $0x10] sm:$0xff]  ;;  %v100_v31 = vadd.s32 104, %v1728_v24  ;;  %v99_v33 = vadd.s32 96, %v1728_v24 }
  0x16   :  { %608 = vmatpush.bf16.msra.mxu2 %v1476_v6  ;;  %84 = vst [vmem:[#allocation2 + $0x19] sm:$0xff] %v1720_v12  ;;  %v1473_v19 = vld [vmem:[#allocation6 + $0x98] sm:$0xff]  ;;  %v1472_v23 = vld [vmem:[#allocation6 + $0x90] sm:$0xff]  ;;  %v1463_v26 = vld [vmem:[#allocation6 + $0x48] sm:$0xff]  ;;  %v214_v34 = vand.u32 7, %v102_v28  ;;  %v207_v35 = vand.u32 7, %v101_v30 }
  0x17   :  { %85 = vst [vmem:[#allocation2 + $0x21] sm:$0xff] %v1723_v13  ;;  %v1455_v27 = vld [vmem:[#allocation6 + $0x8] sm:$0xff]  ;;  %v200_v36 = vand.u32 7, %v100_v31  ;;  %v1462_v37 = vld [vmem:[#allocation6 + $0x40] sm:$0xff]  ;;  %v98_v38 = vadd.s32 88, %v1728_v24  ;;  %v193_v48 = vand.u32 7, %v99_v33 }
  0x18   :  { %452 = vmatpush.bf16.msra.mxu0 %v1467_v7  ;;  %v1471_v32 = vld [vmem:[#allocation6 + $0x88] sm:$0xff]  ;;  %v1454_v39 = vld [vmem:[#allocation6] sm:$0xff]  ;;  %vm1738_vm0 = vcmp.eq.s32.totalorder %v214_v34, %v1731_v29  ;;  %vm1743_vm1 = vcmp.eq.s32.totalorder %v207_v35, %v1731_v29  ;;  %v97_v49 = vadd.s32 80, %v1728_v24  ;;  %v96_v54 = vadd.s32 72, %v1728_v24  ;;  %v723_v42 = vld [vmem:[%s2197_s2] sm:$0x1] }
  0x19   :  { %519 = vmatpush.bf16.msra.mxu1 %v1459_v8  ;;  %v1470_v44 = vld [vmem:[#allocation6 + $0x80] sm:$0xff]  ;;  %1294 = vmatpush.msk.msra.mxu3 %vm1738_vm0, %v1661_v47  ;;  %vm1752_vm2 = vcmp.eq.s32.totalorder %v200_v36, %v1731_v29  ;;  %v186_v53 = vand.u32 7, %v98_v38  ;;  %vm1766_vm3 = vcmp.eq.s32.totalorder %v193_v48, %v1731_v29  ;;  %v95_v58 = vadd.s32 64, %v1728_v24 }
  0x1a   :  { %609 = vmatpush.bf16.msra.mxu2 %v1475_v9  ;;  %v179_v57 = vand.u32 7, %v97_v49  ;;  %v172_v60 = vand.u32 7, %v96_v54  ;;  %v94_v61 = vadd.s32 56, %v1728_v24  ;;  %v93_v0 = vadd.s32 48, %v1728_v24 }
  0x1b   :  { %v357_v40 = vld [vmem:[#allocation2] sm:$0xff]  ;;  %1295 = vmatpush.msk.msra.mxu3 %vm1743_vm1, %v1661_v47  ;;  %vm1775_vm4 = vcmp.eq.s32.totalorder %v186_v53, %v1731_v29  ;;  %v165_v63 = vand.u32 7, %v95_v58  ;;  %v92_v3 = vadd.s32 40, %v1728_v24  ;;  %v88_v31 = vadd.s32 8, %v1728_v24 }
  0x1c   :  { %453 = vmatpush.bf16.msra.mxu0 %v1466_v14  ;;  %v358_v41 = vld [vmem:[#allocation2 + $0x8] sm:$0xff]  ;;  %vm1784_vm5 = vcmp.eq.s32.totalorder %v179_v57, %v1731_v29  ;;  %vm1796_vm6 = vcmp.eq.s32.totalorder %v172_v60, %v1731_v29  ;;  %v158_v2 = vand.u32 7, %v94_v61  ;;  %v151_v5 = vand.u32 7, %v93_v0 }
  0x1d   :  { %520 = vmatpush.bf16.msra.mxu1 %v1458_v15  ;;  %v536_v45 = vld [vmem:[#allocation2 + $0x2] sm:$0xff]  ;;  %v537_v46 = vld [vmem:[#allocation2 + $0xa] sm:$0xff]  ;;  %v361_v52 = vpack.c.bf16 %v358_v41, %v357_v40  ;;  %1296 = vmatpush.msk.msra.mxu3 %vm1752_vm2, %v1661_v47  ;;  %vm1808_vm7 = vcmp.eq.s32.totalorder %v165_v63, %v1731_v29  ;;  %v144_v7 = vand.u32 7, %v92_v3  ;;  %v359_v8 = vld [vmem:[#allocation2 + $0x18] sm:$0xff]  ;;  %v116_v33 = vand.u32 7, %v88_v31 }
  0x1e   :  { %610 = vmatpush.bf16.msra.mxu2 %v1474_v16  ;;  %v540_v55 = vpack.c.bf16 %v537_v46, %v536_v45  ;;  %vm1819_vm8 = vcmp.eq.s32.totalorder %v158_v2, %v1731_v29  ;;  %v360_v9 = vld [vmem:[#allocation2 + $0x20] sm:$0xff]  ;;  %vm1830_vm9 = vcmp.eq.s32.totalorder %v151_v5, %v1731_v29  ;;  %v109_v35 = vand.u32 7, %v1728_v24 }
  0x1f   :  { %1297 = vmatpush.msk.msra.mxu3 %vm1766_vm3, %v1661_v47  ;;  %v538_v14 = vld [vmem:[#allocation2 + $0x1a] sm:$0xff]  ;;  %v539_v15 = vld [vmem:[#allocation2 + $0x22] sm:$0xff]  ;;  %vm1843_vm10 = vcmp.eq.s32.totalorder %v144_v7, %v1731_v29  ;;  %vm1906_vm14 = vcmp.eq.s32.totalorder %v116_v33, %v1731_v29  ;;  %v2235_v36 = vmov 0  ;;  %v1662_v0 = vmov 512.0  }
  0x20   :  { %454 = vmatpush.bf16.msra.mxu0 %v1465_v17  ;;  %v384_v17 = vpack.c.bf16 %v1723_v13, %v1720_v12  ;;  %vm1918_vm15 = vcmp.eq.s32.totalorder %v109_v35, %v1731_v29  ;;  %1545 = vrcp.f32 %v1662_v0  ;;  %v1484_v0 = vld [vmem:[#allocation8 + $0x30] sm:$0xff] }
  0x21   :  { %521 = vmatpush.bf16.msra.mxu1 %v1457_v18  ;;  %1298 = vmatpush.msk.msra.mxu3 %vm1775_vm4, %v1661_v47  ;;  %v362_v18 = vpack.c.bf16 %v360_v9, %v359_v8  ;;  %v2236_v36 = vsel %vm1918_vm15, 4294967295, %v2235_v36 }
  0x22   :  { %611 = vmatpush.bf16.msra.mxu2 %v1473_v19 }
  0x23   :  { %1299 = vmatpush.msk.msra.mxu3 %vm1784_vm5, %v1661_v47 }
  0x24   :  { %455 = vmatpush.bf16.msra.mxu0 %v1464_v20  ;;  %v541_v20 = vpack.c.bf16 %v539_v15, %v538_v14 }
  0x25   :  { %522 = vmatpush.bf16.msra.mxu1 %v1456_v21  ;;  %1300 = vmatpush.msk.msra.mxu3 %vm1796_vm6, %v1661_v47  ;;  %v91_v21 = vadd.s32 32, %v1728_v24 }
  0x26   :  { %612 = vmatpush.bf16.msra.mxu2 %v1472_v23  ;;  %v90_v23 = vadd.s32 24, %v1728_v24  ;;  %v1546_v3 = vpop.eup %1545 }
  0x27   :  { %1301 = vmatpush.msk.msra.mxu3 %vm1808_vm7, %v1661_v47  ;;  %v137_v22 = vand.u32 7, %v91_v21  ;;  %v669_v5 = vmul.f32 512.0, %v1546_v3 }
  0x28   :  { %456 = vmatpush.bf16.msra.mxu0 %v1463_v26  ;;  %v130_v26 = vand.u32 7, %v90_v23 }
  0x29   :  { %523 = vmatpush.bf16.msra.mxu1 %v1455_v27  ;;  %1302 = vmatpush.msk.msra.mxu3 %vm1819_vm8, %v1661_v47  ;;  %vm1871_vm11 = vcmp.eq.s32.totalorder %v137_v22, %v1731_v29  ;;  %v89_v27 = vadd.s32 16, %v1728_v24  ;;  %v670_v14 = vsub.f32 1.0, %v669_v5 }
  0x2a   :  { %613 = vmatpush.bf16.msra.mxu2 %v1471_v32  ;;  %vm1883_vm12 = vcmp.eq.s32.totalorder %v130_v26, %v1731_v29 }
  0x2b   :  { %1303 = vmatpush.msk.msra.mxu3 %vm1830_vm9, %v1661_v47  ;;  %v123_v30 = vand.u32 7, %v89_v27 }
  0x2c   :  { %457 = vmatpush.bf16.msra.mxu0 %v1462_v37 }
  0x2d   :  { %524 = vmatpush.bf16.msra.mxu1 %v1454_v39  ;;  %1304 = vmatpush.msk.msra.mxu3 %vm1843_vm10, %v1661_v47  ;;  %vm1895_vm13 = vcmp.eq.s32.totalorder %v123_v30, %v1731_v29 }
  0x2e   :  { %614 = vmatpush.bf16.msra.mxu2 %v1470_v44 }
  0x2f   :  { %458 = vmatmul.bf16.vlgmr.msra.gmra.mxu0 %v383_v51  ;;  %1305 = vmatpush.msk.msra.mxu3 %vm1871_vm11, %v1661_v47 }
  0x30   :  { %1310 = vmatpush.msk.msrb.mxu0 %vm1738_vm0, %v1661_v47  ;;  %525 = vmatmul.bf16.vlgmr.msra.gmra.mxu1 %v361_v52 }
  0x31   :  { %615 = vmatmul.bf16.vlgmr.msra.gmra.mxu2 %v540_v55  ;;  %1306 = vmatpush.msk.msra.mxu3 %vm1883_vm12, %v1661_v47 }
  0x32   :  { %1311 = vmatpush.msk.msrb.mxu0 %vm1743_vm1, %v1661_v47 }
  0x33   :  { %1307 = vmatpush.msk.msra.mxu3 %vm1895_vm13, %v1661_v47 }
  0x34   :  { %1312 = vmatpush.msk.msrb.mxu0 %vm1752_vm2, %v1661_v47 }
  0x35   :  { %1308 = vmatpush.msk.msra.mxu3 %vm1906_vm14, %v1661_v47 }
  0x36   :  { %1313 = vmatpush.msk.msrb.mxu0 %vm1766_vm3, %v1661_v47 }
  0x37   :  { %1309 = vmatpush.msk.msra.mxu3 %vm1918_vm15, %v1661_v47 }
  0x38   :  { %1314 = vmatpush.msk.msrb.mxu0 %vm1775_vm4, %v1661_v47 }
  0x3a   :  { %1315 = vmatpush.msk.msrb.mxu0 %vm1784_vm5, %v1661_v47 }
  0x3c   :  { %1316 = vmatpush.msk.msrb.mxu0 %vm1796_vm6, %v1661_v47 }
  0x3e   :  { %1317 = vmatpush.msk.msrb.mxu0 %vm1808_vm7, %v1661_v47 }
  0x3f   :  { %463 = vmatmul.bf16.gmra.mxu0 %v384_v17 }
  0x40   :  { %530 = vmatmul.bf16.gmra.mxu1 %v362_v18  ;;  %1318 = vmatpush.msk.msrb.mxu0 %vm1819_vm8, %v1661_v47  ;;  %v671_v18 = vmul.f32 %v1546_v3, %v670_v14  ;;  %v1489_v14 = vld [vmem:[#allocation8 + $0x58] sm:$0xff] }
  0x41   :  { %620 = vmatmul.bf16.gmra.mxu2 %v541_v20 }
  0x42   :  { %1319 = vmatpush.msk.msrb.mxu0 %vm1830_vm9, %v1661_v47  ;;  %v672_v22 = vadd.f32 %v1546_v3, %v671_v18  ;;  %v1482_v18 = vld [vmem:[#allocation8 + $0x20] sm:$0xff] }
  0x44   :  { %1320 = vmatpush.msk.msrb.mxu0 %vm1843_vm10, %v1661_v47 }
  0x46   :  { %1321 = vmatpush.msk.msrb.mxu0 %vm1871_vm11, %v1661_v47 }
  0x48   :  { %1322 = vmatpush.msk.msrb.mxu0 %vm1883_vm12, %v1661_v47 }
  0x4a   :  { %1323 = vmatpush.msk.msrb.mxu0 %vm1895_vm13, %v1661_v47 }
  0x4c   :  { %1324 = vmatpush.msk.msrb.mxu0 %vm1906_vm14, %v1661_v47 }
  0x4e   :  { %1325 = vmatpush.msk.msrb.mxu0 %vm1918_vm15, %v1661_v47 }
  0x50   :  { %1422 = vmatpush.msk.msra.mxu0 %vm1738_vm0, %v1661_v47 }
  0x52   :  { %1423 = vmatpush.msk.msra.mxu0 %vm1743_vm1, %v1661_v47 }
  0x54   :  { %1424 = vmatpush.msk.msra.mxu0 %vm1752_vm2, %v1661_v47 }
  0x56   :  { %1425 = vmatpush.msk.msra.mxu0 %vm1766_vm3, %v1661_v47 }
  0x58   :  { %1426 = vmatpush.msk.msra.mxu0 %vm1775_vm4, %v1661_v47 }
  0x5a   :  { %1427 = vmatpush.msk.msra.mxu0 %vm1784_vm5, %v1661_v47 }
  0x5c   :  { %1428 = vmatpush.msk.msra.mxu0 %vm1796_vm6, %v1661_v47 }
  0x5e   :  { %1429 = vmatpush.msk.msra.mxu0 %vm1808_vm7, %v1661_v47 }
  0x60   :  { %1430 = vmatpush.msk.msra.mxu0 %vm1819_vm8, %v1661_v47 }
  0x62   :  { %1431 = vmatpush.msk.msra.mxu0 %vm1830_vm9, %v1661_v47 }
  0x64   :  { %1432 = vmatpush.msk.msra.mxu0 %vm1843_vm10, %v1661_v47 }
  0x66   :  { %1433 = vmatpush.msk.msra.mxu0 %vm1871_vm11, %v1661_v47 }
  0x68   :  { %1434 = vmatpush.msk.msra.mxu0 %vm1883_vm12, %v1661_v47 }
  0x6a   :  { %1435 = vmatpush.msk.msra.mxu0 %vm1895_vm13, %v1661_v47 }
  0x6c   :  { %1436 = vmatpush.msk.msra.mxu0 %vm1906_vm14, %v1661_v47 }
  0x6e   :  { %1437 = vmatpush.msk.msra.mxu0 %vm1918_vm15, %v1661_v47  ;;  %vm673_vm15 = vweird.f32 %v1546_v3 }
  0x6f   :  { %v1988_v27 = vsel %vm673_vm15, %v1546_v3, %v672_v22  ;;  %v1490_v3 = vld [vmem:[#allocation8 + $0x60] sm:$0xff] }
  0xac   :  { %v459_v24 = vpop.f32.mrf.mxu0 }
  0xad   :  { %v526_v29 = vpop.f32.mrf.mxu1 }
  0xae   :  { %v527_v37 = vadd.f32 %v526_v29, %v459_v24 }
  0xb4   :  { %v616_v38 = vpop.f32.mrf.mxu2  ;;  %v461_v40 = vpop.f32.mrf.mxu0 }
  0xb5   :  { %v1973_v39 = vadd.f32 %v616_v38, %v527_v37  ;;  %v528_v41 = vpop.f32.mrf.mxu1 }
  0xb6   :  { %v529_v44 = vadd.f32 %v528_v41, %v461_v40 }
  0xb7   :  { %646 = vmatmul.f32.vlgmr.msra.gmra.mxu3 %v1973_v39 }
  0xbc   :  { %v618_v45 = vpop.f32.mrf.mxu2  ;;  %v464_v48 = vpop.f32.mrf.mxu0 }
  0xbd   :  { %v1979_v46 = vadd.f32 %v618_v45, %v529_v44  ;;  %v531_v49 = vpop.f32.mrf.mxu1 }
  0xbe   :  { %v532_v51 = vadd.f32 %v531_v49, %v464_v48  ;;  %v1493_v48 = vld [vmem:[#allocation8 + $0x78] sm:$0xff] }
  0xbf   :  { %649 = vmatmul.f32.gmra.mxu3 %v1979_v46  ;;  %854 = vmatpush.bf16.msrb.mxu1 %v1493_v48 }
  0xc4   :  { %v621_v52 = vpop.f32.mrf.mxu2  ;;  %v466_v54 = vpop.f32.mrf.mxu0 }
  0xc5   :  { %v1982_v53 = vadd.f32 %v621_v52, %v532_v51  ;;  %v533_v55 = vpop.f32.mrf.mxu1  ;;  %v1492_v51 = vld [vmem:[#allocation8 + $0x70] sm:$0xff] }
  0xc6   :  { %v534_v57 = vadd.f32 %v533_v55, %v466_v54  ;;  %855 = vmatpush.bf16.msrb.mxu1 %v1492_v51  ;;  %v1485_v54 = vld [vmem:[#allocation8 + $0x38] sm:$0xff] }
  0xc7   :  { %652 = vmatmul.f32.gmra.mxu3 %v1982_v53  ;;  %v1501_v55 = vld [vmem:[#allocation8 + $0xb8] sm:$0xff]  ;;  %921 = vmatpush.bf16.msrb.mxu2 %v1485_v54 }
  0xc8   :  { %1011 = vmatpush.bf16.msrb.mxu3 %v1501_v55 }
  0xcb   :  { %922 = vmatpush.bf16.msrb.mxu2 %v1484_v0 }
  0xcc   :  { %v623_v58 = vpop.f32.mrf.mxu2 }
  0xcd   :  { %v1985_v60 = vadd.f32 %v623_v58, %v534_v57  ;;  %v1491_v57 = vld [vmem:[#allocation8 + $0x68] sm:$0xff] }
  0xce   :  { %856 = vmatpush.bf16.msrb.mxu1 %v1491_v57  ;;  %v743_v57 = vld [vmem:[%s2198_s3] sm:$0x1] }
  0xcf   :  { %655 = vmatmul.f32.gmra.mxu3 %v1985_v60 }
  0xd2   :  { %857 = vmatpush.bf16.msrb.mxu1 %v1490_v3 }
  0xd6   :  { %858 = vmatpush.bf16.msrb.mxu1 %v1489_v14 }
 0x13a   :  { %v647_v61 = vpop.f32.mrf.mxu3 }
 0x142   :  { %v650_v63 = vpop.f32.mrf.mxu3 }
 0x143   :  { %v659_v7 = vadd.f32 %v650_v63, %v647_v61 }
 0x14a   :  { %v653_v2 = vpop.f32.mrf.mxu3 }
 0x14b   :  { %v660_v8 = vadd.f32 %v659_v7, %v653_v2  ;;  %v1500_v2 = vld [vmem:[#allocation8 + $0xb0] sm:$0xff] }
 0x14c   :  { %1012 = vmatpush.bf16.msrb.mxu3 %v1500_v2 }
 0x152   :  { %v656_v9 = vpop.f32.mrf.mxu3 }
 0x153   :  { %v661_v15 = vadd.f32 %v660_v8, %v656_v9  ;;  %v1483_v8 = vld [vmem:[#allocation8 + $0x28] sm:$0xff] }
 0x154   :  { %v1499_v9 = vld [vmem:[#allocation8 + $0xa8] sm:$0xff]  ;;  %923 = vmatpush.bf16.msrb.mxu2 %v1483_v8 }
 0x155   :  { %v662_v17 = vrot.slane %v661_v15, 4  ;;  %1013 = vmatpush.bf16.msrb.mxu3 %v1499_v9 }
 0x157   :  { %v663_v20 = vadd.f32 %v662_v17, %v661_v15 }
 0x158   :  { %924 = vmatpush.bf16.msrb.mxu2 %v1482_v18 }
 0x159   :  { %v664_v21 = vrot.slane %v663_v20, 2 }
 0x15b   :  { %v665_v23 = vadd.f32 %v664_v21, %v663_v20  ;;  %v1498_v20 = vld [vmem:[#allocation8 + $0xa0] sm:$0xff]  ;;  %v1488_v21 = vld [vmem:[#allocation8 + $0x50] sm:$0xff] }
 0x15c   :  { %1014 = vmatpush.bf16.msrb.mxu3 %v1498_v20  ;;  %859 = vmatpush.bf16.msrb.mxu1 %v1488_v21 }
 0x15d   :  { %v666_v26 = vrot.slane %v665_v23, 1 }
 0x15f   :  { %v667_v30 = vadd.f32 %v666_v26, %v665_v23  ;;  %v1481_v26 = vld [vmem:[#allocation8 + $0x18] sm:$0xff] }
 0x160   :  { %925 = vmatpush.bf16.msrb.mxu2 %v1481_v26 }
 0x161   :  { %v1991_v31 = vmul.f32 %v1988_v27, %v667_v30  ;;  %v1497_v30 = vld [vmem:[#allocation8 + $0x98] sm:$0xff] }
 0x162   :  { %1015 = vmatpush.bf16.msrb.mxu3 %v1497_v30 }
 0x163   :  { %v676_v33 = vsub.f32 %v1973_v39, %v1991_v31  ;;  %v677_v24 = vsub.f32 %v1979_v46, %v1991_v31  ;;  %v678_v37 = vsub.f32 %v1982_v53, %v1991_v31  ;;  %v679_v40 = vsub.f32 %v1985_v60, %v1991_v31 }
 0x165   :  { %v680_v35 = vmul.f32 %v676_v33, %v676_v33  ;;  %v681_v29 = vmul.f32 %v677_v24, %v677_v24  ;;  %v682_v38 = vmul.f32 %v678_v37, %v678_v37  ;;  %v683_v41 = vmul.f32 %v679_v40, %v679_v40  ;;  %v1487_v33 = vld [vmem:[#allocation8 + $0x48] sm:$0xff]  ;;  %v1496_v37 = vld [vmem:[#allocation8 + $0x90] sm:$0xff] }
 0x166   :  { %860 = vmatpush.bf16.msrb.mxu1 %v1487_v33  ;;  %1016 = vmatpush.bf16.msrb.mxu3 %v1496_v37  ;;  %v1479_v40 = vld [vmem:[#allocation8 + $0x8] sm:$0xff] }
 0x167   :  { %700 = vmatmul.f32.vlgmr.msrb.gmra.mxu0 %v680_v35 }
 0x16f   :  { %703 = vmatmul.f32.gmra.mxu0 %v681_v29  ;;  %v1480_v29 = vld [vmem:[#allocation8 + $0x10] sm:$0xff] }
 0x170   :  { %926 = vmatpush.bf16.msrb.mxu2 %v1480_v29 }
 0x174   :  { %927 = vmatpush.bf16.msrb.mxu2 %v1479_v40 }
 0x177   :  { %706 = vmatmul.f32.gmra.mxu0 %v682_v38  ;;  %v1486_v38 = vld [vmem:[#allocation8 + $0x40] sm:$0xff] }
 0x178   :  { %861 = vmatpush.bf16.msrb.mxu1 %v1486_v38 }
 0x17c   :  { %1438 = vmatpush.msk.msra.mxu1 %vm1738_vm0, %v1661_v47 }
 0x17e   :  { %1439 = vmatpush.msk.msra.mxu1 %vm1743_vm1, %v1661_v47 }
 0x17f   :  { %709 = vmatmul.f32.gmra.mxu0 %v683_v41  ;;  %v1495_v41 = vld [vmem:[#allocation8 + $0x88] sm:$0xff] }
 0x180   :  { %1017 = vmatpush.bf16.msrb.mxu3 %v1495_v41  ;;  %1440 = vmatpush.msk.msra.mxu1 %vm1752_vm2, %v1661_v47 }
 0x182   :  { %1441 = vmatpush.msk.msra.mxu1 %vm1766_vm3, %v1661_v47 }
 0x184   :  { %1442 = vmatpush.msk.msra.mxu1 %vm1775_vm4, %v1661_v47 }
 0x186   :  { %1443 = vmatpush.msk.msra.mxu1 %vm1784_vm5, %v1661_v47 }
 0x188   :  { %1444 = vmatpush.msk.msra.mxu1 %vm1796_vm6, %v1661_v47 }
 0x18a   :  { %1445 = vmatpush.msk.msra.mxu1 %vm1808_vm7, %v1661_v47 }
 0x18c   :  { %1446 = vmatpush.msk.msra.mxu1 %vm1819_vm8, %v1661_v47 }
 0x18e   :  { %1447 = vmatpush.msk.msra.mxu1 %vm1830_vm9, %v1661_v47 }
 0x190   :  { %1448 = vmatpush.msk.msra.mxu1 %vm1843_vm10, %v1661_v47 }
 0x192   :  { %1449 = vmatpush.msk.msra.mxu1 %vm1871_vm11, %v1661_v47 }
 0x194   :  { %1450 = vmatpush.msk.msra.mxu1 %vm1883_vm12, %v1661_v47 }
 0x196   :  { %1451 = vmatpush.msk.msra.mxu1 %vm1895_vm13, %v1661_v47 }
 0x198   :  { %1452 = vmatpush.msk.msra.mxu1 %vm1906_vm14, %v1661_v47 }
 0x1e4   :  { %v701_v44 = vpop.f32.mrf.mxu0 }
 0x1ec   :  { %v704_v45 = vpop.f32.mrf.mxu0 }
 0x1ed   :  { %v713_v52 = vadd.f32 %v704_v45, %v701_v44  ;;  %v1478_v44 = vld [vmem:[#allocation8] sm:$0xff] }
 0x1ee   :  { %v1494_v45 = vld [vmem:[#allocation8 + $0x80] sm:$0xff]  ;;  %928 = vmatpush.bf16.msrb.mxu2 %v1478_v44 }
 0x1ef   :  { %1018 = vmatpush.bf16.msrb.mxu3 %v1494_v45 }
 0x1f2   :  { %1502 = vmatpush.msk.msra.mxu2 %vm1738_vm0, %v1661_v47 }
 0x1f3   :  { %1518 = vmatpush.msk.msra.mxu3 %vm1738_vm0, %v1661_v47 }
 0x1f4   :  { %v707_v49 = vpop.f32.mrf.mxu0  ;;  %1503 = vmatpush.msk.msra.mxu2 %vm1743_vm1, %v1661_v47 }
 0x1f5   :  { %v714_v58 = vadd.f32 %v713_v52, %v707_v49  ;;  %1519 = vmatpush.msk.msra.mxu3 %vm1743_vm1, %v1661_v47 }
 0x1f6   :  { %1504 = vmatpush.msk.msra.mxu2 %vm1752_vm2, %v1661_v47 }
 0x1f7   :  { %1520 = vmatpush.msk.msra.mxu3 %vm1752_vm2, %v1661_v47  ;;  %vm2237_vm2 = vnez %v2236_v36 }
 0x1f8   :  { %1505 = vmatpush.msk.msra.mxu2 %vm1766_vm3, %v1661_v47  ;;  %1453 = vmatpush.msk.msra.mxu1 %vm2237_vm2, %v1661_v47 }
 0x1f9   :  { %1521 = vmatpush.msk.msra.mxu3 %vm1766_vm3, %v1661_v47 }
 0x1fa   :  { %1506 = vmatpush.msk.msra.mxu2 %vm1775_vm4, %v1661_v47 }
 0x1fb   :  { %1522 = vmatpush.msk.msra.mxu3 %vm1775_vm4, %v1661_v47 }
 0x1fc   :  { %v710_v61 = vpop.f32.mrf.mxu0  ;;  %1507 = vmatpush.msk.msra.mxu2 %vm1784_vm5, %v1661_v47 }
 0x1fd   :  { %v715_v63 = vadd.f32 %v714_v58, %v710_v61  ;;  %1523 = vmatpush.msk.msra.mxu3 %vm1784_vm5, %v1661_v47 }
 0x1fe   :  { %1508 = vmatpush.msk.msra.mxu2 %vm1796_vm6, %v1661_v47 }
 0x1ff   :  { %v716_v5 = vrot.slane %v715_v63, 4  ;;  %1524 = vmatpush.msk.msra.mxu3 %vm1796_vm6, %v1661_v47 }
 0x200   :  { %1509 = vmatpush.msk.msra.mxu2 %vm1808_vm7, %v1661_v47 }
 0x201   :  { %v717_v7 = vadd.f32 %v716_v5, %v715_v63  ;;  %1525 = vmatpush.msk.msra.mxu3 %vm1808_vm7, %v1661_v47 }
 0x202   :  { %1510 = vmatpush.msk.msra.mxu2 %vm1819_vm8, %v1661_v47 }
 0x203   :  { %v718_v15 = vrot.slane %v717_v7, 2  ;;  %1526 = vmatpush.msk.msra.mxu3 %vm1819_vm8, %v1661_v47 }
 0x204   :  { %1511 = vmatpush.msk.msra.mxu2 %vm1830_vm9, %v1661_v47 }
 0x205   :  { %v719_v17 = vadd.f32 %v718_v15, %v717_v7  ;;  %1527 = vmatpush.msk.msra.mxu3 %vm1830_vm9, %v1661_v47 }
 0x206   :  { %1512 = vmatpush.msk.msra.mxu2 %vm1843_vm10, %v1661_v47 }
 0x207   :  { %v720_v22 = vrot.slane %v719_v17, 1  ;;  %1528 = vmatpush.msk.msra.mxu3 %vm1843_vm10, %v1661_v47 }
 0x208   :  { %1513 = vmatpush.msk.msra.mxu2 %vm1871_vm11, %v1661_v47 }
 0x209   :  { %v721_v23 = vadd.f32 %v720_v22, %v719_v17  ;;  %1529 = vmatpush.msk.msra.mxu3 %vm1871_vm11, %v1661_v47 }
 0x20a   :  { %1514 = vmatpush.msk.msra.mxu2 %vm1883_vm12, %v1661_v47 }
 0x20b   :  { %v722_v35 = vmul.f32 %v721_v23, %v1988_v27  ;;  %1530 = vmatpush.msk.msra.mxu3 %vm1883_vm12, %v1661_v47 }
 0x20c   :  { %1515 = vmatpush.msk.msra.mxu2 %vm1895_vm13, %v1661_v47 }
 0x20d   :  { %v724_v24 = vadd.f32 1e-05, %v722_v35  ;;  %1531 = vmatpush.msk.msra.mxu3 %vm1895_vm13, %v1661_v47 }
 0x20e   :  { %1516 = vmatpush.msk.msra.mxu2 %vm1906_vm14, %v1661_v47 }
 0x20f   :  { %1547 = vrsqrt.f32 %v724_v24  ;;  %vm731_vm0 = vweird.f32 %v724_v24  ;;  %1532 = vmatpush.msk.msra.mxu3 %vm1906_vm14, %v1661_v47 }
 0x210   :  { %1517 = vmatpush.msk.msra.mxu2 %vm2237_vm2, %v1661_v47 }
 0x211   :  { %1533 = vmatpush.msk.msra.mxu3 %vm2237_vm2, %v1661_v47 }
 0x215   :  { %v1548_v48 = vpop.eup %1547 }
 0x216   :  { %v726_v49 = vmul.f32 %v1548_v48, %v724_v24  ;;  %vm732_vm15 = vweird.f32 %v1548_v48 }
 0x217   :  { %vm733_vm1 = vmor %vm731_vm0, %vm732_vm15 }
 0x218   :  { %v727_v51 = vmul.f32 %v1548_v48, %v726_v49 }
 0x21a   :  { %v728_v52 = vmul.f32 0.5, %v727_v51 }
 0x21c   :  { %v729_v54 = vsub.f32 1.5, %v728_v52 }
 0x21e   :  { %v730_v43 = vmul.f32 %v1548_v48, %v729_v54 }
 0x220   :  { %v734_v50 = vsel %vm733_vm1, %v1548_v48, %v730_v43 }
 0x221   :  { %v735_v55 = vmul.f32 %v734_v50, %v723_v42 }
 0x223   :  { %v737_v56 = vperm.slane %v735_v55, 0  ;;  %v744_v58 = vmul.f32 %v735_v55, %v1991_v31 }
 0x225   :  { %v745_v59 = vsub.f32 %v743_v57, %v744_v58  ;;  %v739_v62 = vmul.f32 %v737_v56, %v1973_v39  ;;  %v740_v31 = vmul.f32 %v737_v56, %v1979_v46  ;;  %v741_v61 = vmul.f32 %v737_v56, %v1982_v53 }
 0x226   :  { %v742_v63 = vmul.f32 %v737_v56, %v1985_v60 }
 0x227   :  { %v747_v0 = vperm.slane %v745_v59, 0 }
 0x229   :  { %v749_v1 = vadd.f32 %v747_v0, %v739_v62  ;;  %v750_v39 = vadd.f32 %v747_v0, %v740_v31  ;;  %v751_v46 = vadd.f32 %v747_v0, %v741_v61  ;;  %v752_v2 = vadd.f32 %v747_v0, %v742_v63 }
 0x22b   :  { %v753_v4 = vmax.f32 %v749_v1, 0.0  ;;  %v754_v53 = vmax.f32 %v750_v39, 0.0  ;;  %v755_v60 = vmax.f32 %v751_v46, 0.0  ;;  %v756_v3 = vmax.f32 %v752_v2, 0.0 }
 0x22d   :  { %757 = vst [vmem:[#allocation2 + $0x1] sm:$0xff] %v753_v4  ;;  %v787_v6 = vpack.c.bf16 %v754_v53, %v753_v4  ;;  %v788_v32 = vpack.c.bf16 %v756_v3, %v755_v60 }
 0x22e   :  { %758 = vst [vmem:[#allocation2 + $0x9] sm:$0xff] %v754_v53 }
 0x22f   :  { %759 = vst [vmem:[#allocation2 + $0x19] sm:$0xff] %v755_v60  ;;  %862 = vmatmul.bf16.vlgmr.msrb.gmra.mxu1 %v787_v6 }
 0x230   :  { %760 = vst [vmem:[#allocation2 + $0x21] sm:$0xff] %v756_v3 }
 0x234   :  { %v761_v16 = vld [vmem:[#allocation2] sm:$0xff] }
 0x235   :  { %v762_v19 = vld [vmem:[#allocation2 + $0x8] sm:$0xff] }
 0x236   :  { %v940_v25 = vld [vmem:[#allocation2 + $0x2] sm:$0xff]  ;;  %v941_v28 = vld [vmem:[#allocation2 + $0xa] sm:$0xff]  ;;  %v765_v5 = vpack.c.bf16 %v762_v19, %v761_v16  ;;  %v763_v8 = vld [vmem:[#allocation2 + $0x18] sm:$0xff] }
 0x237   :  { %v944_v7 = vpack.c.bf16 %v941_v28, %v940_v25  ;;  %v764_v9 = vld [vmem:[#allocation2 + $0x20] sm:$0xff] }
 0x238   :  { %929 = vmatmul.bf16.vlgmr.msrb.gmra.mxu2 %v765_v5  ;;  %v942_v14 = vld [vmem:[#allocation2 + $0x1a] sm:$0xff]  ;;  %v943_v15 = vld [vmem:[#allocation2 + $0x22] sm:$0xff]  ;;  %v766_v34 = vpack.c.bf16 %v764_v9, %v763_v8 }
 0x239   :  { %1019 = vmatmul.bf16.vlgmr.msrb.gmra.mxu3 %v944_v7  ;;  %v945_v17 = vpack.c.bf16 %v943_v15, %v942_v14 }
 0x23f   :  { %867 = vmatmul.bf16.gmra.mxu1 %v788_v32 }
 0x248   :  { %934 = vmatmul.bf16.gmra.mxu2 %v766_v34 }
 0x249   :  { %1024 = vmatmul.bf16.gmra.mxu3 %v945_v17 }
 0x2ac   :  { %v863_v18 = vpop.f32.mrf.mxu1 }
 0x2b4   :  { %v865_v36 = vpop.f32.mrf.mxu1 }
 0x2bb   :  { %v930_v20 = vpop.f32.mrf.mxu2 }
 0x2bc   :  { %v1020_v21 = vpop.f32.mrf.mxu3  ;;  %v931_v22 = vadd.f32 %v930_v20, %v863_v18  ;;  %v868_v35 = vpop.f32.mrf.mxu1 }
 0x2be   :  { %v2157_v23 = vadd.f32 %v1020_v21, %v931_v22  ;;  %v1120_v22 = vld [vmem:[%s2200_s5] sm:$0x1]  ;;  %s1663_s5 = smov [#allocation9]  }
 0x2c0   :  { %1050 = vmatmul.f32.vlgmr.msra.gmra.mxu0 %v2157_v23 }
 0x2c3   :  { %v932_v47 = vpop.f32.mrf.mxu2 }
 0x2c4   :  { %v1022_v26 = vpop.f32.mrf.mxu3  ;;  %v933_v30 = vadd.f32 %v932_v47, %v865_v36  ;;  %v870_v40 = vpop.f32.mrf.mxu1 }
 0x2c6   :  { %v2160_v33 = vadd.f32 %v1022_v26, %v933_v30 }
 0x2c8   :  { %1053 = vmatmul.f32.gmra.mxu0 %v2160_v33 }
 0x2cb   :  { %v935_v24 = vpop.f32.mrf.mxu2 }
 0x2cc   :  { %v1025_v29 = vpop.f32.mrf.mxu3  ;;  %v936_v37 = vadd.f32 %v935_v24, %v868_v35 }
 0x2ce   :  { %v2163_v38 = vadd.f32 %v1025_v29, %v936_v37 }
 0x2d0   :  { %1056 = vmatmul.f32.vlgmr.msra.gmra.mxu2 %v2163_v38 }
 0x2d3   :  { %v937_v41 = vpop.f32.mrf.mxu2 }
 0x2d4   :  { %v938_v44 = vadd.f32 %v937_v41, %v870_v40  ;;  %v1027_v45 = vpop.f32.mrf.mxu3 }
 0x2d6   :  { %v2166_v48 = vadd.f32 %v1027_v45, %v938_v44 }
 0x2d8   :  { %1059 = vmatmul.f32.gmra.mxu2 %v2166_v48 }
 0x33d   :  { %v1051_v49 = vpop.f32.mrf.mxu0 }
 0x345   :  { %v1054_v52 = vpop.f32.mrf.mxu0 }
 0x346   :  { %v1063_v54 = vadd.f32 %v1054_v52, %v1051_v49 }
 0x353   :  { %v1057_v51 = vpop.f32.mrf.mxu2 }
 0x354   :  { %v1064_v42 = vadd.f32 %v1063_v54, %v1057_v51 }
 0x35b   :  { %v1060_v43 = vpop.f32.mrf.mxu2 }
 0x35c   :  { %v1065_v50 = vadd.f32 %v1064_v42, %v1060_v43 }
 0x35e   :  { %v1066_v55 = vrot.slane %v1065_v50, 4 }
 0x360   :  { %v1067_v56 = vadd.f32 %v1066_v55, %v1065_v50 }
 0x362   :  { %v1068_v57 = vrot.slane %v1067_v56, 2 }
 0x364   :  { %v1069_v58 = vadd.f32 %v1068_v57, %v1067_v56 }
 0x366   :  { %v1070_v59 = vrot.slane %v1069_v58, 1 }
 0x368   :  { %v1071_v62 = vadd.f32 %v1070_v59, %v1069_v58 }
 0x36a   :  { %v1072_v31 = vmul.f32 %v1071_v62, %v1988_v27 }
 0x36c   :  { %v1073_v61 = vsub.f32 %v2157_v23, %v1072_v31  ;;  %v1075_v63 = vsub.f32 %v2163_v38, %v1072_v31  ;;  %v1074_v39 = vsub.f32 %v2160_v33, %v1072_v31  ;;  %v1076_v46 = vsub.f32 %v2166_v48, %v1072_v31 }
 0x36e   :  { %v1077_v0 = vmul.f32 %v1073_v61, %v1073_v61  ;;  %v1079_v1 = vmul.f32 %v1075_v63, %v1075_v63  ;;  %v1078_v2 = vmul.f32 %v1074_v39, %v1074_v39  ;;  %v1080_v4 = vmul.f32 %v1076_v46, %v1076_v46 }
 0x370   :  { %1097 = vmatmul.f32.vlgmr.msra.gmra.mxu1 %v1077_v0  ;;  %1103 = vmatmul.f32.vlgmr.msra.gmra.mxu3 %v1079_v1 }
 0x378   :  { %1100 = vmatmul.f32.gmra.mxu1 %v1078_v2  ;;  %1106 = vmatmul.f32.gmra.mxu3 %v1080_v4 }
 0x3ed   :  { %v1098_v53 = vpop.f32.mrf.mxu1 }
 0x3f3   :  { %v1104_v60 = vpop.f32.mrf.mxu3 }
 0x3f5   :  { %v1101_v3 = vpop.f32.mrf.mxu1 }
 0x3f6   :  { %v1110_v6 = vadd.f32 %v1101_v3, %v1098_v53 }
 0x3f8   :  { %v1111_v16 = vadd.f32 %v1110_v6, %v1104_v60 }
 0x3fb   :  { %v1107_v19 = vpop.f32.mrf.mxu3 }
 0x3fc   :  { %v1112_v25 = vadd.f32 %v1111_v16, %v1107_v19 }
 0x3fe   :  { %v1113_v28 = vrot.slane %v1112_v25, 4 }
 0x400   :  { %v1114_v5 = vadd.f32 %v1113_v28, %v1112_v25 }
 0x402   :  { %v1115_v7 = vrot.slane %v1114_v5, 2 }
 0x404   :  { %v1116_v32 = vadd.f32 %v1115_v7, %v1114_v5 }
 0x406   :  { %v1117_v8 = vrot.slane %v1116_v32, 1 }
 0x408   :  { %v1118_v9 = vadd.f32 %v1117_v8, %v1116_v32 }
 0x40a   :  { %v1119_v14 = vmul.f32 %v1118_v9, %v1988_v27  ;;  %v1140_v27 = vld [vmem:[%s2201_s6] sm:$0x1]  ;;  %s1166_s6 = sshll.u32 %s1663_s5, 4  ;;  %s1167_s6 = int_to_ptr.vmem [resolvable:$true] %s1166_s6 }
 0x40c   :  { %v1121_v15 = vadd.f32 1e-05, %v1119_v14 }
 0x40e   :  { %1549 = vrsqrt.f32 %v1121_v15  ;;  %vm1128_vm4 = vweird.f32 %v1121_v15 }
 0x414   :  { %v1550_v34 = vpop.eup %1549 }
 0x415   :  { %v1123_v17 = vmul.f32 %v1550_v34, %v1121_v15  ;;  %vm1129_vm3 = vweird.f32 %v1550_v34 }
 0x416   :  { %vm1130_vm5 = vmor %vm1128_vm4, %vm1129_vm3 }
 0x417   :  { %v1124_v18 = vmul.f32 %v1550_v34, %v1123_v17 }
 0x419   :  { %v1125_v20 = vmul.f32 0.5, %v1124_v18 }
 0x41b   :  { %v1126_v21 = vsub.f32 1.5, %v1125_v20 }
 0x41d   :  { %v1127_v36 = vmul.f32 %v1550_v34, %v1126_v21 }
 0x41f   :  { %v1131_v47 = vsel %vm1130_vm5, %v1550_v34, %v1127_v36 }
 0x420   :  { %v1132_v26 = vmul.f32 %v1131_v47, %v1120_v22 }
 0x422   :  { %v1134_v30 = vperm.slane %v1132_v26, 0  ;;  %v1141_v35 = vmul.f32 %v1132_v26, %v1072_v31 }
 0x424   :  { %v1142_v24 = vsub.f32 %v1140_v27, %v1141_v35  ;;  %v1136_v29 = vmul.f32 %v1134_v30, %v2157_v23  ;;  %v1137_v40 = vmul.f32 %v1134_v30, %v2160_v33  ;;  %v1138_v41 = vmul.f32 %v1134_v30, %v2163_v38 }
 0x425   :  { %v1139_v44 = vmul.f32 %v1134_v30, %v2166_v48 }
 0x426   :  { %v1144_v37 = vperm.slane %v1142_v24, 0 }
 0x428   :  { %v1146_v45 = vadd.f32 %v1144_v37, %v1136_v29  ;;  %v1147_v49 = vadd.f32 %v1144_v37, %v1137_v40  ;;  %v1148_v51 = vadd.f32 %v1144_v37, %v1138_v41  ;;  %v1149_v52 = vadd.f32 %v1144_v37, %v1139_v44 }
 0x42a   :  { %v1150_v54 = vadd.f32 %v1146_v45, %v1716_v10  ;;  %v1151_v42 = vadd.f32 %v1147_v49, %v1718_v11  ;;  %v1152_v43 = vadd.f32 %v1148_v51, %v1720_v12  ;;  %v1153_v50 = vadd.f32 %v1149_v52, %v1723_v13 }
 0x42c   :  { %v1154_v23 = vmax.f32 %v1150_v54, 0.0  ;;  %v1155_v55 = vmax.f32 %v1151_v42, 0.0  ;;  %v1156_v56 = vmax.f32 %v1152_v43, 0.0  ;;  %v1157_v33 = vmax.f32 %v1153_v50, 0.0 }
 0x42e   :  { %1158 = vst [vmem:[#allocation9] sm:$0xff] %v1154_v23 }
 0x42f   :  { %1159 = vst [vmem:[#allocation9 + $0x8] sm:$0xff] %v1155_v55 }
 0x430   :  { %1160 = vst [vmem:[#allocation9 + $0x10] sm:$0xff] %v1156_v56 }
 0x431   :  { %1161 = vst [vmem:[#allocation9 + $0x18] sm:$0xff] %v1157_v33 }
 0x432   :  { %1174 = dma.vmem_to_hbm [thread:$0]  %s1167_s6, 512, %s1169_s25, [#allocation5], %s1657_s13, %s1657_s13, %s1658_s14  }
 0x433   :  { %1651 = dma.done.wait [#allocation5], 512  }
 0x434   :  { %1652 = vsyncadd [#allocation5], 4294966784 }
 0x435   :  { %1179 = vsyncpa [#allocation4], 1 }
 0x436   :  { %1180 = vsyncpa [#allocation7], 1 }
 0x437   :  { %1181 = vsyncpa [#allocation5], 1 }

</bundles_post_ra>
